<compile_context>
chip_gen: v5e
topology: v5e:2x2
jax: 0.10.0
libtpu: 0.0.40
codegen_flags: <defaults>
</compile_context>

<pallas_src>
import math
import functools

import jax
import jax.numpy as jnp
from jax.experimental import pallas as pl
from jax.experimental.pallas import tpu as pltpu


def make_sinusoidal_pe(d_model: int, max_len: int) -> jnp.ndarray:
    """Parameter setup identical to the PyTorch __init__ (registered buffer)."""
    position = jnp.arange(max_len, dtype=jnp.float32)[:, None]                # [L, 1]
    div_term = jnp.exp(
        jnp.arange(0, d_model, 2, dtype=jnp.float32) * (-math.log(10000.0) / d_model)
    )                                                                         # [D/2]
    pe = jnp.zeros((max_len, 1, d_model), dtype=jnp.float32)
    pe = pe.at[:, 0, 0::2].set(jnp.sin(position * div_term))
    pe = pe.at[:, 0, 1::2].set(jnp.cos(position * div_term))
    return pe


def _pe_kernel(*refs, p: float, apply_dropout: bool):
    """One sequence tile: out = dropout(x + broadcast(pe)).

    Block layout (lane-dense, flattened):
      x_ref / o_ref : (ts, B*D) float32
      pe_ref        : (ts, D)   float32
      seed_ref      : (1,) int32 scalar-prefetch (training path only)
    """
    if apply_dropout:
        seed_ref, x_ref, pe_ref, o_ref = refs
    else:
        x_ref, pe_ref, o_ref = refs

    x = x_ref[...]                       # (ts, B*D)
    pe_tile = pe_ref[...]                # (ts, D)
    ts, width = x.shape
    d_model = pe_tile.shape[-1]
    n_rep = width // d_model

    # Broadcast pe over the batch copies packed along the lane dimension.
    # TODO(synk): pe could be generated fully in-kernel from broadcasted_iota +
    # sin/cos (EUP), removing its HBM stream entirely, if sin/cos lowering is
    # guaranteed on the target Mosaic version.
    pe_b = pe_tile if n_rep == 1 else jnp.concatenate([pe_tile] * n_rep, axis=-1)
    y = x + pe_b

    if apply_dropout:
        # Inverted-scale dropout. torch.nn.Dropout's exact RNG stream cannot be
        # reproduced; we hash (global element index, seed) with a murmur3-style
        # finalizer (int32 wrap-around arithmetic == uint32 bit pattern) and
        # threshold in the integer domain.
        rows = jax.lax.broadcasted_iota(jnp.int32, y.shape, 0)
        cols = jax.lax.broadcasted_iota(jnp.int32, y.shape, 1)
        gid = (pl.program_id(0) * ts + rows) * width + cols
        h = gid * jnp.int32(-1640531527) + seed_ref[0]        # 0x9E3779B9
        h = h ^ ((h >> 16) & jnp.int32(0xFFFF))               # == logical >> 16
        h = h * jnp.int32(-2048144789)                        # 0x85EBCA6B
        h = h ^ ((h >> 13) & jnp.int32(0x7FFFF))              # == logical >> 13
        h = h * jnp.int32(-1028477387)                        # 0xC2B2AE35
        h = h ^ ((h >> 16) & jnp.int32(0xFFFF))
        bits = h & jnp.int32(0x7FFFFF)                        # 23 random bits
        thresh = jnp.int32(int(round(p * float(1 << 23))))
        keep = bits >= thresh                                 # P(keep) = 1 - p
        y = jnp.where(keep, y * jnp.float32(1.0 / (1.0 - p)), jnp.zeros_like(y))

    o_ref[...] = y.astype(o_ref.dtype)


def positional_encoding(
    x: jnp.ndarray,
    pe: jnp.ndarray,
    *,
    p: float = 0.1,
    training: bool = False,
    seed: int = 0,
) -> jnp.ndarray:
    """x: [S, B, D] -> dropout(x + pe[:S], p).  pe: [max_len, 1, D] (or [max_len, D])."""
    S, B, D = x.shape
    assert pe.shape[-1] == D and S <= pe.shape[0]

    pe2 = pe.reshape(pe.shape[0], D)[:S]          # [S, D]
    x2 = x.reshape(S, B * D)                      # lane-dense flatten (free reshape)

    itemsize = jnp.dtype(x.dtype).itemsize
    bytes_per_row = B * D * itemsize

    # ---- tile size: as large as the per-generation VMEM budget allows ------
    try:
        vmem_cap = int(pltpu.get_tpu_info().vmem_capacity_bytes)   # 128 MiB v5e/v6e, 64 MiB v7x
    except Exception:
        vmem_cap = 64 * 1024 * 1024               # conservative fallback (v7x per-TC)
    # Per grid step: ~2x(x tile) + 2x(out tile) + 2x(pe tile) + mask temporaries.
    max_tile_bytes = min(8 << 20, max(1 << 20, vmem_cap // 10))
    ts = max(1, max_tile_bytes // bytes_per_row)
    if ts >= S:
        ts = S                                     # single tile (block == full extent)
    else:
        ts = max(8, (ts // 8) * 8)                 # keep the sublane dim 8-aligned
    grid = (pl.cdiv(S, ts),)                       # ragged last tile handled by Pallas

    vmem_limit = int(min(vmem_cap * 3 // 4,
                         max(32 << 20, 6 * ts * bytes_per_row + (2 << 20))))

    apply_dropout = bool(training) and float(p) > 0.0
    kernel = functools.partial(_pe_kernel, p=float(p), apply_dropout=apply_dropout)

    x_spec = pl.BlockSpec((ts, B * D), lambda i, *_: (i, 0))
    pe_spec = pl.BlockSpec((ts, D), lambda i, *_: (i, 0))
    out_spec = pl.BlockSpec((ts, B * D), lambda i, *_: (i, 0))
    out_shape = jax.ShapeDtypeStruct((S, B * D), x.dtype)

    compiler_params = pltpu.CompilerParams(
        # Sequence tiles are independent (no accumulator): "parallel" lets the
        # grid shard across both TensorCores on v7x; neutral on v5e/v6e.
        dimension_semantics=("parallel",),
        vmem_limit_bytes=vmem_limit,
    )
    # TODO(synk): add input_output_aliases={...: 0} (x -> out) if the caller
    # does not need x afterwards, to halve the HBM footprint of this op.

    if apply_dropout:
        seed_arr = jnp.asarray([seed], dtype=jnp.int32)
        out2 = pl.pallas_call(
            kernel,
            out_shape=out_shape,
            grid_spec=pltpu.PrefetchScalarGridSpec(
                num_scalar_prefetch=1,
                grid=grid,
                in_specs=[x_spec, pe_spec],
                out_specs=out_spec,
            ),
            compiler_params=compiler_params,
        )(seed_arr, x2, pe2)
    else:
        # Eval path: plain grid, no PRNG seed / scalar-prefetch plumbing.
        out2 = pl.pallas_call(
            kernel,
            out_shape=out_shape,
            grid=grid,
            in_specs=[x_spec, pe_spec],
            out_specs=out_spec,
            compiler_params=compiler_params,
        )(x2, pe2)

    return out2.reshape(S, B, D)


if __name__ == "__main__":
    # Small shapes consistent with the module's forward contract.
    seq_len, batch, d_model, max_len = 8, 2, 32, 64

    key = jax.random.PRNGKey(0)
    x = jax.random.normal(key, (seq_len, batch, d_model), dtype=jnp.float32)
    pe = make_sinusoidal_pe(d_model, max_len)

    # Eval mode (dropout = identity): exact match against the pure-JAX reference.
    out_eval = jax.block_until_ready(positional_encoding(x, pe, p=0.1, training=False))
    ref = x + pe[:seq_len]
    assert out_eval.shape == (seq_len, batch, d_model)
    assert jnp.allclose(out_eval, ref, atol=1e-6, rtol=1e-6)

    # Training mode: every element must be either dropped (0) or scaled by 1/(1-p).
    p = 0.1
    out_train = jax.block_until_ready(
        positional_encoding(x, pe, p=p, training=True, seed=123)
    )
    assert out_train.shape == (seq_len, batch, d_model)
    scaled = ref * (1.0 / (1.0 - p))
    is_zero = out_train == 0.0
    is_scaled = jnp.isclose(out_train, scaled, rtol=1e-5, atol=1e-6)
    assert bool(jnp.all(is_zero | is_scaled))
    assert bool(jnp.any(is_scaled))   # P(everything dropped) = p^512 ~ 0

    print("KERNEL_OK")
</pallas_src>

<mosaic_0001>
module attributes {stable_mosaic.version = 11 : i64} {
  func.func @_pe_kernel(%arg0: i32, %arg1: memref<8x64xf32, #tpu.memory_space<vmem>>, %arg2: memref<8x32xf32, #tpu.memory_space<vmem>>, %arg3: memref<8x64xf32, #tpu.memory_space<vmem>>) attributes {dimension_semantics = [#tpu.dimension_semantics<parallel>], iteration_bounds = array<i64: 1>, scalar_prefetch = 0 : i64, scratch_operands = 0 : i64, tpu.core_type = #tpu.core_type<tc>, window_params = [{transform_indices = @transform_0, window_bounds = array<i64: 8, 64>}, {transform_indices = @transform_1, window_bounds = array<i64: 8, 32>}, {transform_indices = @transform_2, window_bounds = array<i64: 8, 64>}]} {
    %c0 = arith.constant 0 : index
    %c0_0 = arith.constant 0 : index
    %0 = vector.load %arg1[%c0, %c0_0] : memref<8x64xf32, #tpu.memory_space<vmem>>, vector<8x64xf32>
    %c0_1 = arith.constant 0 : index
    %c0_2 = arith.constant 0 : index
    %1 = vector.load %arg2[%c0_1, %c0_2] : memref<8x32xf32, #tpu.memory_space<vmem>>, vector<8x32xf32>
    %2 = tpu.concatenate %1, %1 in 1 : vector<8x32xf32>, vector<8x32xf32> -> vector<8x64xf32>
    %3 = arith.addf %0, %2 : vector<8x64xf32>
    %c0_3 = arith.constant 0 : index
    %c0_4 = arith.constant 0 : index
    %4 = vector.load %arg3[%c0_3, %c0_4] : memref<8x64xf32, #tpu.memory_space<vmem>>, vector<8x64xf32>
    tpu.vector_store %arg3[%c0_3, %c0_4], %3 {strides = array<i32>} : memref<8x64xf32, #tpu.memory_space<vmem>>, vector<8x64xf32>,
    return
  }
  func.func @transform_0(%arg0: i32) -> (i32, i32) {
    %c0_i32 = arith.constant 0 : i32
    %c0_i32_0 = arith.constant 0 : i32
    return %arg0, %c0_i32 : i32, i32
  }
  func.func @transform_1(%arg0: i32) -> (i32, i32) {
    %c0_i32 = arith.constant 0 : i32
    %c0_i32_0 = arith.constant 0 : i32
    return %arg0, %c0_i32 : i32, i32
  }
  func.func @transform_2(%arg0: i32) -> (i32, i32) {
    %c0_i32 = arith.constant 0 : i32
    %c0_i32_0 = arith.constant 0 : i32
    return %arg0, %c0_i32 : i32, i32
  }
}

</mosaic_0001>

<bundles_post_ra>
// kernel: tpu_custom_call.1
= control target key start
LH: loop header
LB: loop body
LE: loop exit
PB: predicated region body
PF: predicated region fallthrough
CT: control target
= control target key end

     0   :  { %7 = vsyncpa [#allocation3], 0  ;;  %s179_s0 = inlined_call_operand.hbm [shape: f32[8,64], index: 0, kind: input, shape index: {}]   ;;  %s180_s1 = inlined_call_operand.hbm [shape: f32[8,32], index: 1, kind: input, shape index: {}]   ;;  %s181_s2 = inlined_call_operand.hbm [shape: f32[8,64], index: 2, kind: output, shape index: {}]  }
   0x1   :  { %8 = vsyncpa [#allocation6], 0 }
   0x2   :  { %9 = vsyncpa [#allocation4], 0  ;;  %s15_s11 = sshll.u32 %s179_s0, 4  ;;  %s151_s12 = smov [#allocation2]   ;;  %s16_s11 = int_to_ptr.hbm [resolvable:$true] %s15_s11 }
   0x3   :  { %s17_s13 = sshll.u32 %s151_s12, 4  ;;  %s26_s16 = sshll.u32 %s180_s1, 4  ;;  %s18_s13 = int_to_ptr.vmem [resolvable:$true] %s17_s13  ;;  %s27_s16 = int_to_ptr.hbm [resolvable:$true] %s26_s16 }
   0x4   :  { %20 = dma.hbm_to_vmem [thread:$0]  %s16_s11, 128, %s18_s13, [#allocation3]  }
   0x5   :  { %s152_s17 = smov [#allocation5]  }
   0x6   :  { %s28_s18 = sshll.u32 %s152_s17, 4  ;;  %s29_s18 = int_to_ptr.vmem [resolvable:$true] %s28_s18 }
   0x7   :  { %31 = dma.hbm_to_vmem [thread:$0]  %s27_s16, 128, %s29_s18, [#allocation6]  }
   0x8   :  { %145 = dma.done.wait [#allocation3], 128  }
   0x9   :  { %146 = vsyncadd [#allocation3], 4294967168 }
   0xa   :  { %147 = dma.done.wait [#allocation6], 128  }
   0xb   :  { %148 = vsyncadd [#allocation6], 4294967168  ;;  %v41_v0 = vld [vmem:[#allocation5] sm:$0xff]  ;;  %s153_s0 = smov 32   ;;  %vm46_vm0 = vcmask 261120   ;;  %v40_v1 = vld [vmem:[#allocation2] sm:$0xff] }
   0xc   :  { %43 = vrot.lane.b32.xlu0 %v41_v0, %s153_s0  ;;  %s154_s19 = smov [#allocation7]   ;;  %s58_s1 = sshll.u32 %s181_s2, 4  ;;  %vm49_vm1 = vcmask 523264   ;;  %s59_s1 = int_to_ptr.hbm [resolvable:$true] %s58_s1 }
   0xd   :  { %s56_s20 = sshll.u32 %s154_s19, 4  ;;  %s57_s20 = int_to_ptr.vmem [resolvable:$true] %s56_s20 }
  0x7e   :  { %v44_v2 = vpop.permute.xlu0 %43 }
  0x7f   :  { %v47_v3 = vsel %vm46_vm0, %v41_v0, %v44_v2 }
  0x80   :  { %v48_v4 = vadd.f32 %v47_v3, %v40_v1 }
  0x82   :  { %50 = vst.msk [vmem:[#allocation7] sm:$0xff] %vm49_vm1, %v48_v4 }
  0x83   :  { %61 = dma.vmem_to_hbm [thread:$0]  %s57_s20, 128, %s59_s1, [#allocation4]  }
  0x84   :  { %149 = dma.done.wait [#allocation4], 128  }
  0x85   :  { %150 = vsyncadd [#allocation4], 4294967168 }
  0x86   :  { %66 = vsyncpa [#allocation3], 1 }
  0x87   :  { %67 = vsyncpa [#allocation6], 1 }
  0x88   :  { %68 = vsyncpa [#allocation4], 1 }

</bundles_post_ra>
